<compile_context>
chip_gen: v5e
topology: v5e:2x2
jax: 0.10.0
libtpu: 0.0.40
codegen_flags: <defaults>
</compile_context>

<pallas_src>
import functools

import jax
import jax.numpy as jnp
import numpy as np
from jax.experimental import pallas as pl
from jax.experimental.pallas import tpu as pltpu


# ----------------------------- fused Pallas kernel ------------------------------ #

def _make_cin_kernel(layer_sizes, full_agg, num_fields, batch, emb_size,
                     compute_dtype):
    """Builds the fused CIN kernel (layer loop unrolled at trace time)."""
    F = num_fields
    BE = batch * emb_size
    L = len(layer_sizes)

    def kernel(x_ref, seg_ref, *refs):
        # x_ref:   (F, B*E)        base field embeddings, lane-dense (batch in lanes)
        # seg_ref: (B, B*E)        segment-sum matrix, seg[b, b*E+e] = 1
        # refs:    L augmented weights (S_l, N_l*F + 1)  then the output (B, total_S)
        w_refs, out_ref = refs[:L], refs[L]

        x = x_ref[...]                                     # (F, BE) f32
        seg = seg_ref[...]                                 # (B, BE) f32
        ones_row = jnp.ones((1, BE), dtype=compute_dtype)  # bias row for the fold

        prev = x                                           # (N, BE), N = F at layer 0
        off = 0
        for l, (w_ref, size) in enumerate(zip(w_refs, layer_sizes)):
            n = prev.shape[0]
            # z[n*F + f, :] = prev[n, :] * x[f, :]  (outer product over fields,
            # flattened into the channel axis; lane axis carries batch*emb)
            z = (prev[:, None, :] * x[None, :, :]).reshape(n * F, BE)
            # fold Conv1d bias into the matmul: ones row in Z, bias column in W
            z_aug = jnp.concatenate([z.astype(compute_dtype), ones_row], axis=0)
            # 1x1 Conv1d (+ bias, + eval-mode BN scale) == one lane-dense MXU matmul
            y = jnp.dot(w_ref[...], z_aug,
                        preferred_element_type=jnp.float32)        # (S, BE) f32

            if (not full_agg) and l < L - 1:
                nxt, direct = y[: size // 2, :], y[size // 2:, :]
            else:
                nxt, direct = y, y

            sd = direct.shape[0]
            # per-sample sum over the embedding slots:
            #   chunk[b, s] = sum_e direct[s, b*E + e]
            chunk = jnp.einsum("bc,sc->bs", seg, direct,
                               preferred_element_type=jnp.float32)  # (B, sd)
            out_ref[:, off: off + sd] = chunk.astype(out_ref.dtype)
            off += sd
            prev = nxt

    return kernel


def cin_forward(x, params, layer_sizes, full_agg=False,
                compute_dtype=jnp.float32):
    """Fused Pallas CIN forward. x: (B, num_fields, emb) -> (B, output_size).

    compute_dtype: dtype of the MXU matmul operands (set jnp.bfloat16 on v6e/v7x
    for the native MXU path; accumulation stays f32 either way).
    """
    B, F, E = x.shape
    layer_sizes = tuple(layer_sizes)
    eps = 1e-5
    # eval-mode BatchNorm1d (mean=0, var=1, gamma=1, beta=0) folded into the conv
    bn_scale = 1.0 / np.sqrt(1.0 + eps)

    # lane-dense layout: batch folded into the lane axis -> (F, B*E)
    x_lane = jnp.transpose(x, (1, 0, 2)).reshape(F, B * E).astype(jnp.float32)
    # segment-sum matrix for the in-kernel emb-axis reduction: seg[b, b*E+e] = 1
    seg = jnp.repeat(jnp.eye(B, dtype=jnp.float32), E, axis=1)     # (B, B*E)
    # fold bias (extra column) and BN scale into the weights, cast for the MXU
    w_augs = [
        (jnp.concatenate([w, b], axis=1) * bn_scale).astype(compute_dtype)
        for (w, b) in params
    ]

    total_s = sum(
        s if (full_agg or i == len(layer_sizes) - 1) else s // 2
        for i, s in enumerate(layer_sizes))

    kernel = _make_cin_kernel(layer_sizes, full_agg, F, B, E, compute_dtype)
    # single grid step: whole problem fits comfortably in VMEM on v5e/v6e/v7x
    return pl.pallas_call(
        kernel,
        out_shape=jax.ShapeDtypeStruct((B, total_s), jnp.float32),
    )(x_lane, seg, *w_augs)


# ------------------------------ parameter builder -------------------------------- #

def make_cin_params(key, num_fields, layer_sizes, full_agg=False):
    """Deterministic Conv1d(kernel_size=1) weight/bias per layer."""
    params = []
    conv_size = num_fields
    for layer_num, size in enumerate(layer_sizes):
        input_size = num_fields * conv_size
        key, kw, kb = jax.random.split(key, 3)
        w = jax.random.normal(kw, (size, input_size), jnp.float32) * 0.05
        b = jax.random.normal(kb, (size, 1), jnp.float32) * 0.05
        params.append((w, b))
        if not full_agg and layer_num < len(layer_sizes) - 1:
            conv_size = size // 2
        else:
            conv_size = size
    return params


# --------------------------- pure-JAX reference ----------------------------- #

def cin_reference(x, params, layer_sizes, full_agg=False):
    eps = 1e-5
    bn_scale = 1.0 / jnp.sqrt(1.0 + eps)
    B, F, E = x.shape
    agg = []
    out = x
    for layer_num, ((w, b), size) in enumerate(zip(params, layer_sizes)):
        z = jnp.einsum("rne,rfe->rnfe", out, x).reshape(B, -1, E)
        y = (jnp.einsum("sc,rce->rse", w, z) + b[None]) * bn_scale
        if not full_agg and layer_num < len(layer_sizes) - 1:
            out, direct = y[:, : size // 2, :], y[:, size // 2:, :]
        else:
            out, direct = y, y
        agg.append(direct)
    return jnp.concatenate(agg, axis=1).sum(axis=-1)


# --------------------------------- main ------------------------------------ #

if __name__ == "__main__":
    batch = 4
    num_fields = 8
    emb_size = 16
    layer_sizes = (16, 8)          # full_agg=False -> all but last must be even
    full_agg = False

    key = jax.random.PRNGKey(0)
    kx, kp = jax.random.split(key)
    x = jax.random.normal(kx, (batch, num_fields, emb_size), jnp.float32)
    params = make_cin_params(kp, num_fields, layer_sizes, full_agg)

    fwd = jax.jit(functools.partial(
        cin_forward, layer_sizes=layer_sizes, full_agg=full_agg))
    out = fwd(x, params)
    jax.block_until_ready(out)

    ref = cin_reference(x, params, layer_sizes, full_agg)
    expected_size = sum(
        s if (full_agg or i == len(layer_sizes) - 1) else s // 2
        for i, s in enumerate(layer_sizes))
    assert out.shape == (batch, expected_size), out.shape
    np.testing.assert_allclose(np.asarray(out), np.asarray(ref),
                               rtol=1e-4, atol=1e-4)
    print("KERNEL_OK")
</pallas_src>

<mosaic_0001>
module attributes {stable_mosaic.version = 11 : i64} {
  func.func @kernel(%arg0: memref<8x64xf32, #tpu.memory_space<vmem>>, %arg1: memref<4x64xf32, #tpu.memory_space<vmem>>, %arg2: memref<16x65xf32, #tpu.memory_space<vmem>>, %arg3: memref<8x65xf32, #tpu.memory_space<vmem>>, %arg4: memref<4x16xf32, #tpu.memory_space<vmem>>) attributes {dimension_semantics = [], scalar_prefetch = 0 : i64, scratch_operands = 0 : i64, tpu.core_type = #tpu.core_type<tc>} {
    %c0 = arith.constant 0 : index
    %c0_0 = arith.constant 0 : index
    %0 = vector.load %arg0[%c0, %c0_0] : memref<8x64xf32, #tpu.memory_space<vmem>>, vector<8x64xf32>
    %c0_1 = arith.constant 0 : index
    %c0_2 = arith.constant 0 : index
    %1 = vector.load %arg1[%c0_1, %c0_2] : memref<4x64xf32, #tpu.memory_space<vmem>>, vector<4x64xf32>
    %cst = arith.constant 1.000000e+00 : f32
    %2 = vector.broadcast %cst : f32 to vector<1x64xf32>
    %3 = vector.shape_cast %0 : vector<8x64xf32> to vector<8x1x64xf32>
    %4 = vector.shape_cast %0 : vector<8x64xf32> to vector<1x8x64xf32>
    %5 = vector.broadcast %3 : vector<8x1x64xf32> to vector<8x8x64xf32>
    %6 = vector.broadcast %4 : vector<1x8x64xf32> to vector<8x8x64xf32>
    %7 = arith.mulf %5, %6 : vector<8x8x64xf32>
    %8 = vector.shape_cast %7 : vector<8x8x64xf32> to vector<64x64xf32>
    %9 = tpu.concatenate %8, %2 in 0 : vector<64x64xf32>, vector<1x64xf32> -> vector<65x64xf32>
    %c0_3 = arith.constant 0 : index
    %c0_4 = arith.constant 0 : index
    %10 = vector.load %arg2[%c0_3, %c0_4] : memref<16x65xf32, #tpu.memory_space<vmem>>, vector<16x65xf32>
    %cst_5 = arith.constant dense<0.000000e+00> : vector<16x64xf32>
    %11 = tpu.matmul %10, %9, %cst_5 {dimension_numbers = #tpu.dot_dimension_numbers<[1], [0], [0], [1], [0, 0, 1, 1], [], []>} : vector<16x65xf32>, vector<65x64xf32>, vector<16x64xf32> -> vector<16x64xf32>
    %12 = vector.extract_strided_slice %11 {offsets = [0, 0], sizes = [8, 64], strides = [1, 1]} : vector<16x64xf32> to vector<8x64xf32>
    %13 = vector.extract_strided_slice %11 {offsets = [8, 0], sizes = [8, 64], strides = [1, 1]} : vector<16x64xf32> to vector<8x64xf32>
    "tpu.trace_start"() <{level = 10 : i32, message = "bc,sc->bs"}> : () -> ()
    %cst_6 = arith.constant dense<0.000000e+00> : vector<4x8xf32>
    %14 = tpu.matmul %1, %13, %cst_6 {dimension_numbers = #tpu.dot_dimension_numbers<[1], [1], [0], [0], [0, 0, 1, 0], [], []>} : vector<4x64xf32>, vector<8x64xf32>, vector<4x8xf32> -> vector<4x8xf32>
    "tpu.trace_stop"() : () -> ()
    %c0_7 = arith.constant 0 : index
    %c0_8 = arith.constant 0 : index
    %15 = vector.load %arg4[%c0_7, %c0_8] : memref<4x16xf32, #tpu.memory_space<vmem>>, vector<4x8xf32>
    tpu.vector_store %arg4[%c0_7, %c0_8], %14 {strides = array<i32>} : memref<4x16xf32, #tpu.memory_space<vmem>>, vector<4x8xf32>,
    %16 = vector.shape_cast %12 : vector<8x64xf32> to vector<8x1x64xf32>
    %17 = vector.shape_cast %0 : vector<8x64xf32> to vector<1x8x64xf32>
    %18 = vector.broadcast %16 : vector<8x1x64xf32> to vector<8x8x64xf32>
    %19 = vector.broadcast %17 : vector<1x8x64xf32> to vector<8x8x64xf32>
    %20 = arith.mulf %18, %19 : vector<8x8x64xf32>
    %21 = vector.shape_cast %20 : vector<8x8x64xf32> to vector<64x64xf32>
    %22 = tpu.concatenate %21, %2 in 0 : vector<64x64xf32>, vector<1x64xf32> -> vector<65x64xf32>
    %c0_9 = arith.constant 0 : index
    %c0_10 = arith.constant 0 : index
    %23 = vector.load %arg3[%c0_9, %c0_10] : memref<8x65xf32, #tpu.memory_space<vmem>>, vector<8x65xf32>
    %cst_11 = arith.constant dense<0.000000e+00> : vector<8x64xf32>
    %24 = tpu.matmul %23, %22, %cst_11 {dimension_numbers = #tpu.dot_dimension_numbers<[1], [0], [0], [1], [0, 0, 1, 1], [], []>} : vector<8x65xf32>, vector<65x64xf32>, vector<8x64xf32> -> vector<8x64xf32>
    "tpu.trace_start"() <{level = 10 : i32, message = "bc,sc->bs"}> : () -> ()
    %cst_12 = arith.constant dense<0.000000e+00> : vector<4x8xf32>
    %25 = tpu.matmul %1, %24, %cst_12 {dimension_numbers = #tpu.dot_dimension_numbers<[1], [1], [0], [0], [0, 0, 1, 0], [], []>} : vector<4x64xf32>, vector<8x64xf32>, vector<4x8xf32> -> vector<4x8xf32>
    "tpu.trace_stop"() : () -> ()
    %c0_13 = arith.constant 0 : index
    %c8 = arith.constant 8 : index
    %26 = vector.load %arg4[%c0_13, %c8] : memref<4x16xf32, #tpu.memory_space<vmem>>, vector<4x8xf32>
    tpu.vector_store %arg4[%c0_13, %c8], %25 {strides = array<i32>} : memref<4x16xf32, #tpu.memory_space<vmem>>, vector<4x8xf32>,
    return
  }
}

</mosaic_0001>

<bundles_post_ra>
// kernel: cin_forward.1
= control target key start
LH: loop header
LB: loop body
LE: loop exit
PB: predicated region body
PF: predicated region fallthrough
CT: control target
= control target key end

     0   :  { %vm61_vm0 = vcmask 1040384   ;;  %v256_v1 = vmov 1.0   ;;  %s331_s0 = inlined_call_operand.vmem [shape: f32[8,64], index: 0, kind: input, shape index: {}]   ;;  %s332_s1 = inlined_call_operand.vmem [shape: f32[4,64], index: 1, kind: input, shape index: {}]   ;;  %s333_s2 = inlined_call_operand.vmem [shape: f32[16,65], index: 2, kind: input, shape index: {}]   ;;  %s334_s3 = inlined_call_operand.vmem [shape: f32[8,65], index: 3, kind: input, shape index: {}]   ;;  %s335_s4 = inlined_call_operand.hbm [shape: f32[4,16], index: 4, kind: output, shape index: {}]  }
   0x1   :  { %v287_v0 = vld [vmem:[%s331_s0] sm:$0xff]  ;;  %218 = vmatpush.msk.msra.mxu0 %vm61_vm0, %v256_v1  ;;  %223 = vmatpush.msk.msra.mxu2 %vm61_vm0, %v256_v1 }
   0x2   :  { %v27_v2 = vrot.slane %v287_v0, 7  ;;  %v26_v3 = vrot.slane %v287_v0, 6  ;;  %v25_v4 = vrot.slane %v287_v0, 5  ;;  %v24_v5 = vrot.slane %v287_v0, 4 }
   0x3   :  { %9 = vsyncpa [#allocation3], 0  ;;  %v23_v9 = vrot.slane %v287_v0, 3  ;;  %v22_v13 = vrot.slane %v287_v0, 2  ;;  %v21_v16 = vrot.slane %v287_v0, 1  ;;  %v28_v22 = vperm.slane %v287_v0, 0 }
   0x4   :  { %v35_v6 = vperm.slane %v27_v2, 0  ;;  %v34_v7 = vperm.slane %v26_v3, 0  ;;  %v33_v8 = vperm.slane %v25_v4, 0  ;;  %v32_v12 = vperm.slane %v24_v5, 0  ;;  %v52_v25 = vld [vmem:[%s333_s2] sm:$0xff]  ;;  %v53_v26 = vld [vmem:[%s333_s2 + $0x8] sm:$0xff] }
   0x5   :  { %v31_v15 = vperm.slane %v23_v9, 0  ;;  %v30_v18 = vperm.slane %v22_v13, 0  ;;  %v29_v20 = vperm.slane %v21_v16, 0  ;;  %v44_v24 = vmul.f32 %v28_v22, %v287_v0  ;;  %v149_v51 = vld [vmem:[%s334_s3] sm:$0xff]  ;;  %s257_s23 = smov 8   ;;  %s258_s3 = smov [#allocation2]  }
   0x6   :  { %v51_v10 = vmul.f32 %v35_v6, %v287_v0  ;;  %v50_v11 = vmul.f32 %v34_v7, %v287_v0  ;;  %v49_v14 = vmul.f32 %v33_v8, %v287_v0  ;;  %v48_v17 = vmul.f32 %v32_v12, %v287_v0  ;;  %v19_v53 = vld [vmem:[%s332_s1] sm:$0xf]  ;;  %s207_s24 = sshll.u32 %s258_s3, 4  ;;  %s209_s27 = sshll.u32 %s335_s4, 4  ;;  %s208_s24 = int_to_ptr.vmem [resolvable:$true] %s207_s24  ;;  %s210_s27 = int_to_ptr.hbm [resolvable:$true] %s209_s27 }
   0x7   :  { %v47_v19 = vmul.f32 %v31_v15, %v287_v0  ;;  %v46_v21 = vmul.f32 %v30_v18, %v287_v0  ;;  %v45_v23 = vmul.f32 %v29_v20, %v287_v0  ;;  %vm54_vm1 = vcmask 531456  }
   0x8   :  { %73 = vmatpush.msra.mxu0 %v51_v10  ;;  %vm88_vm2 = vcmask 523264   ;;  %vm115_vm3 = vcmask 60416   ;;  %vm200_vm4 = vcmask 126016  }
   0xa   :  { %74 = vmatpush.msra.mxu0 %v50_v11 }
   0xc   :  { %75 = vmatpush.msra.mxu0 %v49_v14 }
   0xe   :  { %76 = vmatpush.msra.mxu0 %v48_v17 }
  0x10   :  { %77 = vmatpush.msra.mxu0 %v47_v19 }
  0x12   :  { %78 = vmatpush.msra.mxu0 %v46_v21 }
  0x14   :  { %79 = vmatpush.msra.mxu0 %v45_v23 }
  0x16   :  { %80 = vmatpush.msra.mxu0 %v44_v24 }
  0x17   :  { %219 = vmatmul.msk.f32.vlgmr.msra.gmra.mxu0 %vm54_vm1, %v52_v25 }
  0x1f   :  { %220 = vmatmul.msk.f32.gmra.mxu0 %vm54_vm1, %v53_v26 }
  0x94   :  { %v82_v27 = vpop.f32.mrf.mxu0 }
  0x95   :  { %v124_v28 = vrot.slane %v82_v27, 7  ;;  %v123_v29 = vrot.slane %v82_v27, 6  ;;  %v122_v30 = vrot.slane %v82_v27, 5  ;;  %v121_v33 = vrot.slane %v82_v27, 4 }
  0x96   :  { %v120_v36 = vrot.slane %v82_v27, 3  ;;  %v119_v39 = vrot.slane %v82_v27, 2  ;;  %v118_v42 = vrot.slane %v82_v27, 1  ;;  %v125_v48 = vperm.slane %v82_v27, 0 }
  0x97   :  { %v132_v31 = vperm.slane %v124_v28, 0  ;;  %v131_v32 = vperm.slane %v123_v29, 0  ;;  %v130_v35 = vperm.slane %v122_v30, 0  ;;  %v129_v38 = vperm.slane %v121_v33, 0 }
  0x98   :  { %v128_v41 = vperm.slane %v120_v36, 0  ;;  %v127_v44 = vperm.slane %v119_v39, 0  ;;  %v126_v46 = vperm.slane %v118_v42, 0  ;;  %v141_v50 = vmul.f32 %v125_v48, %v287_v0 }
  0x99   :  { %v148_v34 = vmul.f32 %v132_v31, %v287_v0  ;;  %v147_v37 = vmul.f32 %v131_v32, %v287_v0  ;;  %v146_v40 = vmul.f32 %v130_v35, %v287_v0  ;;  %v145_v43 = vmul.f32 %v129_v38, %v287_v0 }
  0x9a   :  { %v144_v45 = vmul.f32 %v128_v41, %v287_v0  ;;  %v143_v47 = vmul.f32 %v127_v44, %v287_v0  ;;  %v142_v49 = vmul.f32 %v126_v46, %v287_v0 }
  0x9b   :  { %161 = vmatpush.msra.mxu2 %v148_v34 }
  0x9c   :  { %v85_v52 = vpop.f32.mrf.mxu0 }
  0x9d   :  { %162 = vmatpush.msra.mxu2 %v147_v37  ;;  %221 = vmatpush.xpose.msk.msra.mxu1 %vm88_vm2, %v85_v52 }
  0x9f   :  { %163 = vmatpush.msra.mxu2 %v146_v40 }
  0xa0   :  { %222 = vmatmul.msk.f32.vlgmr.msra.gmra.mxu1 %vm88_vm2, %v19_v53 }
  0xa1   :  { %164 = vmatpush.msra.mxu2 %v145_v43 }
  0xa3   :  { %165 = vmatpush.msra.mxu2 %v144_v45 }
  0xa5   :  { %166 = vmatpush.msra.mxu2 %v143_v47 }
  0xa7   :  { %167 = vmatpush.msra.mxu2 %v142_v49 }
  0xa9   :  { %168 = vmatpush.msra.mxu2 %v141_v50 }
  0xaa   :  { %224 = vmatmul.msk.f32.vlgmr.msra.gmra.mxu2 %vm54_vm1, %v149_v51 }
 0x11d   :  { %v112_v55 = vpop.f32.mrf.mxu1 }
 0x11e   :  { %116 = vst.msk [vmem:[#allocation2] sm:$0xf] %vm115_vm3, %v112_v55 }
 0x12d   :  { %v170_v54 = vpop.f32.mrf.mxu2 }
 0x12e   :  { %225 = vmatpush.xpose.msk.msra.mxu3 %vm88_vm2, %v170_v54 }
 0x131   :  { %226 = vmatmul.msk.f32.vlgmr.msra.gmra.mxu3 %vm88_vm2, %v19_v53 }
 0x1b4   :  { %v193_v56 = vpop.f32.mrf.mxu3 }
 0x1b5   :  { %197 = vrot.lane.b32.xlu0 %v193_v56, %s257_s23 }
 0x227   :  { %v198_v57 = vpop.permute.xlu0 %197 }
 0x228   :  { %201 = vst.msk [vmem:[#allocation2] sm:$0xf] %vm200_vm4, %v198_v57 }
 0x229   :  { %212 = dma.vmem_to_hbm [thread:$0]  %s208_s24, 64, %s210_s27, [#allocation3]  }
 0x22a   :  { %254 = dma.done.wait [#allocation3], 64  }
 0x22b   :  { %255 = vsyncadd [#allocation3], 4294967232 }
 0x22c   :  { %217 = vsyncpa [#allocation3], 1 }

</bundles_post_ra>
